<compile_context>
chip_gen: v5e
topology: v5e:2x2
jax: 0.10.0
libtpu: 0.0.40
codegen_flags: <defaults>
</compile_context>

<pallas_src>
import functools

import jax
import jax.numpy as jnp
from jax import lax
from jax.experimental import pallas as pl
from jax.experimental.pallas import tpu as pltpu

LANE = 128          # lane width (fast axis)
CHUNK = 512         # rows per inner-loop iteration (64 vregs per operand)
MAX_TILE_R = 8192   # rows per grid step (4 MiB per f32 input per buffer)


def _round_up(x, m):
    return (x + m - 1) // m * m


def _partial_sums(x_ref, t_ref, *, tile_r, rows, block, masked):
    """Sums sig(x)*t and sig(x)+t over this (tile_r, LANE) block -> two (8, LANE)."""
    n_chunks = tile_r // CHUNK
    zeros = jnp.zeros((8, LANE), jnp.float32)

    def body(k, carry):
        acc_i, acc_d = carry
        off = pl.multiple_of(k * CHUNK, CHUNK)
        xs = x_ref[pl.ds(off, CHUNK), :].astype(jnp.float32)
        ts = t_ref[pl.ds(off, CHUNK), :].astype(jnp.float32)
        # sigmoid(x) = 0.5 * (1 + tanh(x/2)): single EUP push per vreg.
        sx = 0.5 * (jnp.tanh(0.5 * xs) + 1.0)
        if masked:
            # Row-index compare only (never a flat element index), so int32 is
            # safe for any realistic tensor size.  jnp.where fully masks the
            # unspecified padding of partial blocks (including NaN/Inf).
            row = lax.broadcasted_iota(jnp.int32, (CHUNK, LANE), 0)
            valid = (block * tile_r + off + row) < rows
            sx = jnp.where(valid, sx, 0.0)
            ts = jnp.where(valid, ts, 0.0)
        # VALU-only vreg-tree pre-reduction of the chunk into one vreg each.
        acc_i = acc_i + jnp.sum((sx * ts).reshape(CHUNK // 8, 8, LANE), axis=0)
        acc_d = acc_d + jnp.sum((sx + ts).reshape(CHUNK // 8, 8, LANE), axis=0)
        return acc_i, acc_d

    return lax.fori_loop(0, n_chunks, body, (zeros, zeros))


def _dice_kernel(x_ref, t_ref, inter_ref, denom_ref, *,
                 rows, tile_r, steps, needs_mask):
    c = pl.program_id(0)   # core split   ("parallel")
    i = pl.program_id(1)   # row blocks   ("arbitrary" / reduction)

    @pl.when(i == 0)
    def _():
        inter_ref[...] = jnp.zeros_like(inter_ref)
        denom_ref[...] = jnp.zeros_like(denom_ref)

    block = c * steps + i   # logical (unclamped) row-block index

    def accumulate(masked):
        ai, ad = _partial_sums(x_ref, t_ref, tile_r=tile_r, rows=rows,
                               block=block, masked=masked)
        inter_ref[...] += ai
        denom_ref[...] += ad

    if needs_mask:
        full = (block + 1) * tile_r <= rows   # entire block in range?

        @pl.when(full)
        def _():
            accumulate(False)

        @pl.when(jnp.logical_not(full))
        def _():
            accumulate(True)
    else:
        accumulate(False)


def dice_loss(inputs, targets, smooth=1.0):
    """Matches torch: 1 - (2*sum(sig(x)*t) + s) / (sum(sig(x)) + sum(t) + s)."""
    total = int(inputs.size)
    x = inputs.reshape(-1)        # free reshape; native dtype kept (no upcast)
    t = targets.reshape(-1)

    rows = total // LANE
    main = rows * LANE
    rem = total - main

    inter = jnp.float32(0.0)
    denom = jnp.float32(0.0)

    if rows > 0:
        if rem:
            # TODO(synk): the ragged prefix slice still costs one copy of the
            # main part; a truly zero-copy path would need a 1-D BlockSpec.
            xm = x[:main].reshape(rows, LANE)
            tm = t[:main].reshape(rows, LANE)
        else:
            xm = x.reshape(rows, LANE)
            tm = t.reshape(rows, LANE)

        tile_r = int(min(MAX_TILE_R, _round_up(rows, CHUNK)))
        total_blocks = int(pl.cdiv(rows, tile_r))
        num_par = 2 if total_blocks >= 2 else 1        # dual-TC split (v7x)
        steps = int(pl.cdiv(total_blocks, num_par))
        needs_mask = (rows % tile_r != 0) or (num_par * steps != total_blocks)

        if num_par * steps > total_blocks:
            # Overhang step on the last core: clamp the block index so the DMA
            # stays in bounds; the kernel's row mask zeroes its contribution.
            def in_map(c, i):
                return (jnp.minimum(c * steps + i, total_blocks - 1), 0)
        else:
            def in_map(c, i):
                return (c * steps + i, 0)

        def out_map(c, i):
            return (c, 0, 0)

        # Double-buffered input blocks + headroom for per-chunk intermediates.
        vmem_bytes = 2 * tile_r * LANE * (xm.dtype.itemsize + tm.dtype.itemsize)
        vmem_bytes = int(min(vmem_bytes + (16 << 20), 64 << 20))  # v7x: 64 MiB/TC

        inter_p, denom_p = pl.pallas_call(
            functools.partial(_dice_kernel, rows=rows, tile_r=tile_r,
                              steps=steps, needs_mask=bool(needs_mask)),
            out_shape=(jax.ShapeDtypeStruct((num_par, 8, LANE), jnp.float32),
                       jax.ShapeDtypeStruct((num_par, 8, LANE), jnp.float32)),
            grid_spec=pltpu.PrefetchScalarGridSpec(
                num_scalar_prefetch=0,
                grid=(num_par, steps),
                in_specs=[pl.BlockSpec((tile_r, LANE), in_map),
                          pl.BlockSpec((tile_r, LANE), in_map)],
                out_specs=[pl.BlockSpec((None, 8, LANE), out_map),
                           pl.BlockSpec((None, 8, LANE), out_map)],
            ),
            compiler_params=pltpu.CompilerParams(
                dimension_semantics=("parallel", "arbitrary"),
                vmem_limit_bytes=vmem_bytes),
        )(xm, tm)
        inter = jnp.sum(inter_p)
        denom = jnp.sum(denom_p)

    if rem:
        # Trailing < 128 elements: plain JAX (avoids a full-tensor pad copy).
        tx = jax.nn.sigmoid(x[main:].astype(jnp.float32))
        tt = t[main:].astype(jnp.float32)
        inter = inter + jnp.sum(tx * tt)
        denom = denom + jnp.sum(tx) + jnp.sum(tt)

    s = jnp.float32(smooth)
    return jnp.float32(1.0) - (2.0 * inter + s) / (denom + s)


def _ref_dice(x, t, smooth=1.0):
    xs = jax.nn.sigmoid(x.astype(jnp.float32)).reshape(-1)
    ts = t.astype(jnp.float32).reshape(-1)
    inter = jnp.sum(xs * ts)
    return 1.0 - (2.0 * inter + smooth) / (jnp.sum(xs) + jnp.sum(ts) + smooth)


if __name__ == "__main__":
    key = jax.random.PRNGKey(0)
    k1, k2, k3, k4 = jax.random.split(key, 4)

    # 1) NCHW-like f32 logits + binary f32 targets (seg-head shapes).
    x = jax.random.normal(k1, (2, 4, 16, 16), dtype=jnp.float32)
    tgt = (jax.random.uniform(k2, (2, 4, 16, 16)) > 0.5).astype(jnp.float32)
    loss = dice_loss(x, tgt, smooth=1.0)
    jax.block_until_ready(loss)
    assert jnp.allclose(loss, _ref_dice(x, tgt), atol=1e-5, rtol=1e-5), loss

    # 2) Ragged size (not a multiple of 128) — JAX tail + in-kernel row mask.
    x2 = jax.random.normal(k3, (1, 1000), dtype=jnp.float32)
    t2 = (jax.random.uniform(k4, (1, 1000)) > 0.5).astype(jnp.float32)
    loss2 = dice_loss(x2, t2, smooth=1.0)
    jax.block_until_ready(loss2)
    assert jnp.allclose(loss2, _ref_dice(x2, t2), atol=1e-5, rtol=1e-5), loss2

    # 3) bf16 logits fed in native dtype (no wrapper upcast), f32 targets.
    x3 = jax.random.normal(k1, (4, 8, 32, 32), dtype=jnp.bfloat16)
    t3 = (jax.random.uniform(k2, (4, 8, 32, 32)) > 0.5).astype(jnp.float32)
    loss3 = dice_loss(x3, t3, smooth=1.0)
    jax.block_until_ready(loss3)
    assert jnp.allclose(loss3, _ref_dice(x3, t3), atol=1e-4, rtol=1e-4), loss3

    # 4) Multi-block case: exercises the 2-way core split, the clamped
    #    overhang step and the partial last block (rows=16800 -> 3 blocks).
    x4 = jax.random.normal(k3, (1, 5, 672, 640), dtype=jnp.float32)
    t4 = (jax.random.uniform(k4, (1, 5, 672, 640)) > 0.5).astype(jnp.float32)
    loss4 = dice_loss(x4, t4, smooth=1.0)
    jax.block_until_ready(loss4)
    assert jnp.allclose(loss4, _ref_dice(x4, t4), atol=1e-4, rtol=1e-4), loss4

    print("KERNEL_OK")
</pallas_src>

<mosaic_0001>
module attributes {stable_mosaic.version = 11 : i64} {
  func.func @_dice_kernel(%arg0: i32, %arg1: i32, %arg2: memref<512x128xf32, #tpu.memory_space<vmem>>, %arg3: memref<512x128xf32, #tpu.memory_space<vmem>>, %arg4: memref<1x8x128xf32, #tpu.memory_space<vmem>>, %arg5: memref<1x8x128xf32, #tpu.memory_space<vmem>>) attributes {dimension_semantics = [#tpu.dimension_semantics<parallel>, #tpu.dimension_semantics<arbitrary>], iteration_bounds = array<i64: 1, 1>, scalar_prefetch = 0 : i64, scratch_operands = 0 : i64, tpu.core_type = #tpu.core_type<tc>, window_params = [{transform_indices = @transform_0, window_bounds = array<i64: 512, 128>}, {transform_indices = @transform_1, window_bounds = array<i64: 512, 128>}, {transform_indices = @transform_2, window_bounds = array<i64: 1, 8, 128>}, {transform_indices = @transform_3, window_bounds = array<i64: 1, 8, 128>}]} {
    %c0_i32 = arith.constant 0 : i32
    %0 = arith.cmpi eq, %arg1, %c0_i32 : i32
    %1 = arith.extui %0 : i1 to i32
    %c0_i32_0 = arith.constant 0 : i32
    %2 = arith.cmpi ne, %1, %c0_i32_0 : i32
    scf.if %2 {
      %cst = arith.constant 0.000000e+00 : f32
      %13 = vector.broadcast %cst : f32 to vector<8x128xf32>
      %c0 = arith.constant 0 : index
      %c0_4 = arith.constant 0 : index
      %c0_5 = arith.constant 0 : index
      %14 = vector.load %arg4[%c0, %c0_4, %c0_5] : memref<1x8x128xf32, #tpu.memory_space<vmem>>, vector<1x8x128xf32>
      %15 = vector.shape_cast %14 : vector<1x8x128xf32> to vector<8x128xf32>
      %16 = vector.shape_cast %13 : vector<8x128xf32> to vector<1x8x128xf32>
      tpu.vector_store %arg4[%c0, %c0_4, %c0_5], %16 {strides = array<i32>} : memref<1x8x128xf32, #tpu.memory_space<vmem>>, vector<1x8x128xf32>,
      %cst_6 = arith.constant 0.000000e+00 : f32
      %17 = vector.broadcast %cst_6 : f32 to vector<8x128xf32>
      %c0_7 = arith.constant 0 : index
      %c0_8 = arith.constant 0 : index
      %c0_9 = arith.constant 0 : index
      %18 = vector.load %arg5[%c0_7, %c0_8, %c0_9] : memref<1x8x128xf32, #tpu.memory_space<vmem>>, vector<1x8x128xf32>
      %19 = vector.shape_cast %18 : vector<1x8x128xf32> to vector<8x128xf32>
      %20 = vector.shape_cast %17 : vector<8x128xf32> to vector<1x8x128xf32>
      tpu.vector_store %arg5[%c0_7, %c0_8, %c0_9], %20 {strides = array<i32>} : memref<1x8x128xf32, #tpu.memory_space<vmem>>, vector<1x8x128xf32>,
    } else {
    }
    %c1_i32 = arith.constant 1 : i32
    %3 = arith.muli %arg0, %c1_i32 : i32
    %4 = arith.addi %3, %arg1 : i32
    %c1_i32_1 = arith.constant 1 : i32
    %5 = arith.addi %4, %c1_i32_1 : i32
    %c512_i32 = arith.constant 512 : i32
    %6 = arith.muli %5, %c512_i32 : i32
    %c16_i32 = arith.constant 16 : i32
    %7 = arith.cmpi sle, %6, %c16_i32 : i32
    %8 = arith.extui %7 : i1 to i32
    %c0_i32_2 = arith.constant 0 : i32
    %9 = arith.cmpi ne, %8, %c0_i32_2 : i32
    scf.if %9 {
      %cst = arith.constant 0.000000e+00 : f32
      %13 = vector.broadcast %cst : f32 to vector<8x128xf32>
      %c0_i32_4 = arith.constant 0 : i32
      %c512_i32_5 = arith.constant 512 : i32
      %14 = arith.muli %c0_i32_4, %c512_i32_5 : i32
      %15 = tpu.assume_multiple %14, 512 : i32
      %16 = arith.index_cast %15 : i32 to index
      %c0 = arith.constant 0 : index
      %17 = vector.load %arg2[%16, %c0] : memref<512x128xf32, #tpu.memory_space<vmem>>, vector<512x128xf32>
      %18 = arith.index_cast %15 : i32 to index
      %c0_6 = arith.constant 0 : index
      %19 = vector.load %arg3[%18, %c0_6] : memref<512x128xf32, #tpu.memory_space<vmem>>, vector<512x128xf32>
      %cst_7 = arith.constant 5.000000e-01 : f32
      %20 = vector.broadcast %cst_7 : f32 to vector<512x128xf32>
      %21 = arith.mulf %20, %17 : vector<512x128xf32>
      %22 = math.tanh %21 : vector<512x128xf32>
      %cst_8 = arith.constant 1.000000e+00 : f32
      %23 = vector.broadcast %cst_8 : f32 to vector<512x128xf32>
      %24 = arith.addf %22, %23 : vector<512x128xf32>
      %cst_9 = arith.constant 5.000000e-01 : f32
      %25 = vector.broadcast %cst_9 : f32 to vector<512x128xf32>
      %26 = arith.mulf %25, %24 : vector<512x128xf32>
      %27 = arith.mulf %26, %19 : vector<512x128xf32>
      %28 = vector.shape_cast %27 : vector<512x128xf32> to vector<64x8x128xf32>
      %cst_10 = arith.constant dense<0.000000e+00> : vector<8x128xf32>
      %29 = vector.multi_reduction <add>, %28, %cst_10 [0] : vector<64x8x128xf32> to vector<8x128xf32>
      %30 = arith.addf %13, %29 : vector<8x128xf32>
      %31 = arith.addf %26, %19 : vector<512x128xf32>
      %32 = vector.shape_cast %31 : vector<512x128xf32> to vector<64x8x128xf32>
      %cst_11 = arith.constant dense<0.000000e+00> : vector<8x128xf32>
      %33 = vector.multi_reduction <add>, %32, %cst_11 [0] : vector<64x8x128xf32> to vector<8x128xf32>
      %34 = arith.addf %13, %33 : vector<8x128xf32>
      %c1_i32_12 = arith.constant 1 : i32
      %c0_13 = arith.constant 0 : index
      %c0_14 = arith.constant 0 : index
      %c0_15 = arith.constant 0 : index
      %35 = vector.load %arg4[%c0_13, %c0_14, %c0_15] : memref<1x8x128xf32, #tpu.memory_space<vmem>>, vector<1x8x128xf32>
      %36 = vector.shape_cast %35 : vector<1x8x128xf32> to vector<8x128xf32>
      %37 = arith.addf %36, %30 : vector<8x128xf32>
      %c0_16 = arith.constant 0 : index
      %c0_17 = arith.constant 0 : index
      %c0_18 = arith.constant 0 : index
      %38 = vector.load %arg4[%c0_16, %c0_17, %c0_18] : memref<1x8x128xf32, #tpu.memory_space<vmem>>, vector<1x8x128xf32>
      %39 = vector.shape_cast %38 : vector<1x8x128xf32> to vector<8x128xf32>
      %40 = vector.shape_cast %37 : vector<8x128xf32> to vector<1x8x128xf32>
      tpu.vector_store %arg4[%c0_16, %c0_17, %c0_18], %40 {strides = array<i32>} : memref<1x8x128xf32, #tpu.memory_space<vmem>>, vector<1x8x128xf32>,
      %c0_19 = arith.constant 0 : index
      %c0_20 = arith.constant 0 : index
      %c0_21 = arith.constant 0 : index
      %41 = vector.load %arg5[%c0_19, %c0_20, %c0_21] : memref<1x8x128xf32, #tpu.memory_space<vmem>>, vector<1x8x128xf32>
      %42 = vector.shape_cast %41 : vector<1x8x128xf32> to vector<8x128xf32>
      %43 = arith.addf %42, %34 : vector<8x128xf32>
      %c0_22 = arith.constant 0 : index
      %c0_23 = arith.constant 0 : index
      %c0_24 = arith.constant 0 : index
      %44 = vector.load %arg5[%c0_22, %c0_23, %c0_24] : memref<1x8x128xf32, #tpu.memory_space<vmem>>, vector<1x8x128xf32>
      %45 = vector.shape_cast %44 : vector<1x8x128xf32> to vector<8x128xf32>
      %46 = vector.shape_cast %43 : vector<8x128xf32> to vector<1x8x128xf32>
      tpu.vector_store %arg5[%c0_22, %c0_23, %c0_24], %46 {strides = array<i32>} : memref<1x8x128xf32, #tpu.memory_space<vmem>>, vector<1x8x128xf32>,
    } else {
    }
    %true = arith.constant true
    %10 = arith.xori %7, %true : i1
    %11 = arith.extui %10 : i1 to i32
    %c0_i32_3 = arith.constant 0 : i32
    %12 = arith.cmpi ne, %11, %c0_i32_3 : i32
    scf.if %12 {
      %cst = arith.constant 0.000000e+00 : f32
      %13 = vector.broadcast %cst : f32 to vector<8x128xf32>
      %c0_i32_4 = arith.constant 0 : i32
      %c512_i32_5 = arith.constant 512 : i32
      %14 = arith.muli %c0_i32_4, %c512_i32_5 : i32
      %15 = tpu.assume_multiple %14, 512 : i32
      %16 = arith.index_cast %15 : i32 to index
      %c0 = arith.constant 0 : index
      %17 = vector.load %arg2[%16, %c0] : memref<512x128xf32, #tpu.memory_space<vmem>>, vector<512x128xf32>
      %18 = arith.index_cast %15 : i32 to index
      %c0_6 = arith.constant 0 : index
      %19 = vector.load %arg3[%18, %c0_6] : memref<512x128xf32, #tpu.memory_space<vmem>>, vector<512x128xf32>
      %cst_7 = arith.constant 5.000000e-01 : f32
      %20 = vector.broadcast %cst_7 : f32 to vector<512x128xf32>
      %21 = arith.mulf %20, %17 : vector<512x128xf32>
      %22 = math.tanh %21 : vector<512x128xf32>
      %cst_8 = arith.constant 1.000000e+00 : f32
      %23 = vector.broadcast %cst_8 : f32 to vector<512x128xf32>
      %24 = arith.addf %22, %23 : vector<512x128xf32>
      %cst_9 = arith.constant 5.000000e-01 : f32
      %25 = vector.broadcast %cst_9 : f32 to vector<512x128xf32>
      %26 = arith.mulf %25, %24 : vector<512x128xf32>
      %27 = tpu.iota {dimensions = array<i32: 0>} : vector<512x128xi32>
      %c512_i32_10 = arith.constant 512 : i32
      %28 = arith.muli %4, %c512_i32_10 : i32
      %29 = arith.addi %28, %15 : i32
      %30 = vector.broadcast %29 : i32 to vector<512x128xi32>
      %31 = arith.addi %30, %27 : vector<512x128xi32>
      %c16_i32_11 = arith.constant 16 : i32
      %32 = vector.broadcast %c16_i32_11 : i32 to vector<512x128xi32>
      %33 = arith.cmpi slt, %31, %32 : vector<512x128xi32>
      %cst_12 = arith.constant 0.000000e+00 : f32
      %34 = vector.broadcast %cst_12 : f32 to vector<512x128xf32>
      %35 = arith.select %33, %26, %34 : vector<512x128xi1>, vector<512x128xf32>
      %cst_13 = arith.constant 0.000000e+00 : f32
      %36 = vector.broadcast %cst_13 : f32 to vector<512x128xf32>
      %37 = arith.select %33, %19, %36 : vector<512x128xi1>, vector<512x128xf32>
      %38 = arith.mulf %35, %37 : vector<512x128xf32>
      %39 = vector.shape_cast %38 : vector<512x128xf32> to vector<64x8x128xf32>
      %cst_14 = arith.constant dense<0.000000e+00> : vector<8x128xf32>
      %40 = vector.multi_reduction <add>, %39, %cst_14 [0] : vector<64x8x128xf32> to vector<8x128xf32>
      %41 = arith.addf %13, %40 : vector<8x128xf32>
      %42 = arith.addf %35, %37 : vector<512x128xf32>
      %43 = vector.shape_cast %42 : vector<512x128xf32> to vector<64x8x128xf32>
      %cst_15 = arith.constant dense<0.000000e+00> : vector<8x128xf32>
      %44 = vector.multi_reduction <add>, %43, %cst_15 [0] : vector<64x8x128xf32> to vector<8x128xf32>
      %45 = arith.addf %13, %44 : vector<8x128xf32>
      %c1_i32_16 = arith.constant 1 : i32
      %c0_17 = arith.constant 0 : index
      %c0_18 = arith.constant 0 : index
      %c0_19 = arith.constant 0 : index
      %46 = vector.load %arg4[%c0_17, %c0_18, %c0_19] : memref<1x8x128xf32, #tpu.memory_space<vmem>>, vector<1x8x128xf32>
      %47 = vector.shape_cast %46 : vector<1x8x128xf32> to vector<8x128xf32>
      %48 = arith.addf %47, %41 : vector<8x128xf32>
      %c0_20 = arith.constant 0 : index
      %c0_21 = arith.constant 0 : index
      %c0_22 = arith.constant 0 : index
      %49 = vector.load %arg4[%c0_20, %c0_21, %c0_22] : memref<1x8x128xf32, #tpu.memory_space<vmem>>, vector<1x8x128xf32>
      %50 = vector.shape_cast %49 : vector<1x8x128xf32> to vector<8x128xf32>
      %51 = vector.shape_cast %48 : vector<8x128xf32> to vector<1x8x128xf32>
      tpu.vector_store %arg4[%c0_20, %c0_21, %c0_22], %51 {strides = array<i32>} : memref<1x8x128xf32, #tpu.memory_space<vmem>>, vector<1x8x128xf32>,
      %c0_23 = arith.constant 0 : index
      %c0_24 = arith.constant 0 : index
      %c0_25 = arith.constant 0 : index
      %52 = vector.load %arg5[%c0_23, %c0_24, %c0_25] : memref<1x8x128xf32, #tpu.memory_space<vmem>>, vector<1x8x128xf32>
      %53 = vector.shape_cast %52 : vector<1x8x128xf32> to vector<8x128xf32>
      %54 = arith.addf %53, %45 : vector<8x128xf32>
      %c0_26 = arith.constant 0 : index
      %c0_27 = arith.constant 0 : index
      %c0_28 = arith.constant 0 : index
      %55 = vector.load %arg5[%c0_26, %c0_27, %c0_28] : memref<1x8x128xf32, #tpu.memory_space<vmem>>, vector<1x8x128xf32>
      %56 = vector.shape_cast %55 : vector<1x8x128xf32> to vector<8x128xf32>
      %57 = vector.shape_cast %54 : vector<8x128xf32> to vector<1x8x128xf32>
      tpu.vector_store %arg5[%c0_26, %c0_27, %c0_28], %57 {strides = array<i32>} : memref<1x8x128xf32, #tpu.memory_space<vmem>>, vector<1x8x128xf32>,
    } else {
    }
    return
  }
  func.func @transform_0(%arg0: i32, %arg1: i32) -> (i32, i32) {
    %c1_i32 = arith.constant 1 : i32
    %0 = arith.muli %arg0, %c1_i32 : i32
    %1 = arith.addi %0, %arg1 : i32
    %c0_i32 = arith.constant 0 : i32
    %c0_i32_0 = arith.constant 0 : i32
    return %1, %c0_i32 : i32, i32
  }
  func.func @transform_1(%arg0: i32, %arg1: i32) -> (i32, i32) {
    %c1_i32 = arith.constant 1 : i32
    %0 = arith.muli %arg0, %c1_i32 : i32
    %1 = arith.addi %0, %arg1 : i32
    %c0_i32 = arith.constant 0 : i32
    %c0_i32_0 = arith.constant 0 : i32
    return %1, %c0_i32 : i32, i32
  }
  func.func @transform_2(%arg0: i32, %arg1: i32) -> (i32, i32, i32) {
    %c0_i32 = arith.constant 0 : i32
    %c0_i32_0 = arith.constant 0 : i32
    %c0_i32_1 = arith.constant 0 : i32
    return %arg0, %c0_i32, %c0_i32_0 : i32, i32, i32
  }
  func.func @transform_3(%arg0: i32, %arg1: i32) -> (i32, i32, i32) {
    %c0_i32 = arith.constant 0 : i32
    %c0_i32_0 = arith.constant 0 : i32
    %c0_i32_1 = arith.constant 0 : i32
    return %arg0, %c0_i32, %c0_i32_0 : i32, i32, i32
  }
}

</mosaic_0001>

<bundles_post_ra>
// kernel: tpu_custom_call.1
= control target key start
LH: loop header
LB: loop body
LE: loop exit
PB: predicated region body
PF: predicated region fallthrough
CT: control target
= control target key end

     0   :  { %9 = vsyncpa [#allocation3], 0  ;;  %s1893_s0 = inlined_call_operand.hbm [shape: f32[16,128], index: 0, kind: input, shape index: {}]   ;;  %s1894_s1 = inlined_call_operand.hbm [shape: f32[16,128], index: 1, kind: input, shape index: {}]   ;;  %s1895_s2 = inlined_call_operand.hbm [shape: f32[1,8,128], index: 2, kind: output, shape index: {0}]   ;;  %s1896_s3 = inlined_call_operand.hbm [shape: f32[1,8,128], index: 3, kind: output, shape index: {1}]  }
   0x1   :  { %10 = vsyncpa [#allocation6], 0 }
   0x2   :  { %11 = vsyncpa [#allocation4], 0 }
   0x3   :  { %12 = vsyncpa [#allocation9], 0 }
   0x4   :  { %21 = vsyncadd [#allocation3], 7936  ;;  %s26_s14 = sshll.u32 %s1893_s0, 4  ;;  %s1855_s15 = smov [#allocation2]   ;;  %s27_s14 = int_to_ptr.hbm [resolvable:$true] %s26_s14 }
   0x5   :  { %s28_s16 = sshll.u32 %s1855_s15, 4  ;;  %s1856_s17 = smov 128   ;;  %s29_s16 = int_to_ptr.vmem [resolvable:$true] %s28_s16 }
   0x6   :  { %s1857_s18 = smov 8  }
   0x7   :  { %34 = dma.hbm_to_vmem [thread:$0]  %s27_s14, 256, %s29_s16, [#allocation3], %s1856_s17, %s1856_s17, %s1857_s18  }
   0x8   :  { %43 = vsyncadd [#allocation6], 7936  ;;  %s48_s21 = sshll.u32 %s1894_s1, 4  ;;  %s1858_s22 = smov [#allocation5]   ;;  %s49_s21 = int_to_ptr.hbm [resolvable:$true] %s48_s21 }
   0x9   :  { %s50_s23 = sshll.u32 %s1858_s22, 4  ;;  %s51_s23 = int_to_ptr.vmem [resolvable:$true] %s50_s23 }
   0xa   :  { %56 = dma.hbm_to_vmem [thread:$0]  %s49_s21, 256, %s51_s23, [#allocation6], %s1856_s17, %s1856_s17, %s1857_s18  }
   0xb   :  { %1847 = dma.done.wait [#allocation3], 8192  }
   0xc   :  { %1848 = vsyncadd [#allocation3], 4294959104 }
   0xd   :  { %1849 = dma.done.wait [#allocation6], 8192  }
   0xe   :  { %1850 = vsyncadd [#allocation6], 4294959104  ;;  %v736_v0 = vld [vmem:[#allocation2] sm:$0xff]  ;;  %v737_v1 = vld [vmem:[#allocation2 + $0x8] sm:$0xff]  ;;  %s1859_s0 = smov [#allocation7]   ;;  %s1713_s26 = sshll.u32 %s1895_s2, 4  ;;  %s1714_s26 = int_to_ptr.hbm [resolvable:$true] %s1713_s26 }
   0xf   :  { %v864_v2 = vmul.f32 0.5, %v736_v0  ;;  %v865_v3 = vmul.f32 0.5, %v737_v1  ;;  %v800_v7 = vld [vmem:[#allocation5] sm:$0xff]  ;;  %v801_v9 = vld [vmem:[#allocation5 + $0x8] sm:$0xff]  ;;  %s1711_s1 = sshll.u32 %s1859_s0, 4  ;;  %s1860_s27 = smov [#allocation8]   ;;  %s1712_s1 = int_to_ptr.vmem [resolvable:$true] %s1711_s1 }
  0x10   :  { %s1722_s28 = sshll.u32 %s1860_s27, 4  ;;  %s1724_s4 = sshll.u32 %s1896_s3, 4  ;;  %s1723_s28 = int_to_ptr.vmem [resolvable:$true] %s1722_s28  ;;  %s1725_s4 = int_to_ptr.hbm [resolvable:$true] %s1724_s4 }
  0x11   :  { %1747 = vtanh.f32 %v864_v2 }
  0x12   :  { %1749 = vtanh.f32 %v865_v3 }
  0x17   :  { %v1748_v4 = vpop.eup %1747 }
  0x18   :  { %v1750_v5 = vpop.eup %1749  ;;  %v992_v6 = vadd.f32 1.0, %v1748_v4 }
  0x19   :  { %v993_v8 = vadd.f32 1.0, %v1750_v5 }
  0x1a   :  { %v1056_v10 = vmul.f32 0.5, %v992_v6 }
  0x1b   :  { %v1057_v11 = vmul.f32 0.5, %v993_v8 }
  0x1c   :  { %v1444_v12 = vmul.f32 %v1056_v10, %v800_v7  ;;  %v1572_v13 = vadd.f32 %v1056_v10, %v800_v7 }
  0x1d   :  { %v1445_v14 = vmul.f32 %v1057_v11, %v801_v9  ;;  %v1573_v15 = vadd.f32 %v1057_v11, %v801_v9 }
  0x1f   :  { %v1508_v16 = vadd.f32 %v1445_v14, %v1444_v12  ;;  %v1636_v17 = vadd.f32 %v1573_v15, %v1572_v13 }
  0x21   :  { %1702 = vst [vmem:[#allocation7] sm:$0xff] %v1508_v16 }
  0x22   :  { %1705 = vst [vmem:[#allocation8] sm:$0xff] %v1636_v17  ;;  %1716 = dma.vmem_to_hbm [thread:$0]  %s1712_s1, 128, %s1714_s26, [#allocation4]  }
  0x23   :  { %1727 = dma.vmem_to_hbm [thread:$0]  %s1723_s28, 128, %s1725_s4, [#allocation9]  }
  0x24   :  { %1851 = dma.done.wait [#allocation4], 128  }
  0x25   :  { %1852 = vsyncadd [#allocation4], 4294967168 }
  0x26   :  { %1853 = dma.done.wait [#allocation9], 128  }
  0x27   :  { %1854 = vsyncadd [#allocation9], 4294967168 }
  0x28   :  { %1736 = vsyncpa [#allocation3], 1 }
  0x29   :  { %1737 = vsyncpa [#allocation6], 1 }
  0x2a   :  { %1738 = vsyncpa [#allocation4], 1 }
  0x2b   :  { %1739 = vsyncpa [#allocation9], 1 }

</bundles_post_ra>
